<compile_context>
chip_gen: v7x
topology: tpu7x:2x2x1
jax: 0.10.0
libtpu: 0.0.40
codegen_flags: <defaults>
</compile_context>

<pallas_src>
import math

import jax
import jax.numpy as jnp
from jax.experimental import pallas as pl
from jax.experimental.pallas import tpu as pltpu

MAX_TEXT_LEN = 256


def _round_up(x, m):
    return ((x + m - 1) // m) * m


def _contrastive_embed_kernel(scale_ref, v_ref, t_ref, add_ref, o_ref):
    # scale_ref: (1, 1)                f32 in SMEM
    # v_ref:     (1, TQ, D)            bf16
    # t_ref:     (1, MAX_TEXT_LEN, D)  bf16 (resident across q tiles)
    # add_ref:   (1, 1, MAX_TEXT_LEN)  f32, = bias where token valid else -inf
    # o_ref:     (1, TQ, MAX_TEXT_LEN) f32
    res = jax.lax.dot_general(
        v_ref[0], t_ref[0],
        dimension_numbers=(((1,), (1,)), ((), ())),   # contract D vs D, no transpose
        preferred_element_type=jnp.float32)           # (TQ, MAX_TEXT_LEN) f32
    o_ref[0] = (res * scale_ref[0, 0] + add_ref[0]).astype(o_ref.dtype)


def contrastive_embed(visual_feat, encoded_text, text_token_mask,
                      log_scale=None, bias=None, *,
                      tq=256, matmul_dtype=jnp.bfloat16):
    """ContrastiveEmbed forward.

    visual_feat      : [B, Q, D] float
    encoded_text     : [B, T, D] float
    text_token_mask  : [B, T]    bool (True = valid token)
    log_scale        : float / 'auto' / 'none' / None (matches the PyTorch module)
    bias             : scalar or None
    returns          : [B, Q, MAX_TEXT_LEN] float32
    """
    B, Q, D = visual_feat.shape
    _, T, _ = encoded_text.shape
    if T > MAX_TEXT_LEN:
        raise ValueError(f"text length {T} exceeds max_text_len {MAX_TEXT_LEN}")

    # --- resolve scale (scalar, computed once outside the kernel) ------------
    if log_scale is None or (isinstance(log_scale, str) and log_scale == "none"):
        scale = jnp.float32(1.0)
    elif isinstance(log_scale, str) and log_scale == "auto":
        scale = jnp.float32(1.0 / math.sqrt(D))
    else:
        scale = jnp.exp(jnp.asarray(log_scale, jnp.float32).reshape(()))
    scale = scale.reshape(1, 1)

    # --- pad text to MAX_TEXT_LEN; fold bias + mask + -inf pad into one row --
    if T != MAX_TEXT_LEN:
        text_p = jnp.pad(encoded_text, ((0, 0), (0, MAX_TEXT_LEN - T), (0, 0)))
        mask_p = jnp.pad(text_token_mask, ((0, 0), (0, MAX_TEXT_LEN - T)))
    else:
        text_p, mask_p = encoded_text, text_token_mask

    bias_val = jnp.float32(0.0) if bias is None else jnp.asarray(bias, jnp.float32).reshape(())
    add_row = jnp.where(mask_p, bias_val, jnp.float32(-jnp.inf))
    add_row = add_row.reshape(B, 1, MAX_TEXT_LEN).astype(jnp.float32)

    # --- pad / tile the query axis -------------------------------------------
    tq = min(tq, _round_up(Q, 8))
    Qp = _round_up(Q, tq)
    visual_p = visual_feat if Qp == Q else jnp.pad(visual_feat, ((0, 0), (0, Qp - Q), (0, 0)))

    v_mm = visual_p.astype(matmul_dtype)
    t_mm = text_p.astype(matmul_dtype)

    grid = (B, Qp // tq)
    grid_spec = pltpu.PrefetchScalarGridSpec(
        num_scalar_prefetch=0,
        grid=grid,
        in_specs=[
            pl.BlockSpec(memory_space=pltpu.MemorySpace.SMEM),                 # scale
            pl.BlockSpec((1, tq, D), lambda b, q: (b, q, 0)),                  # visual tile
            pl.BlockSpec((1, MAX_TEXT_LEN, D), lambda b, q: (b, 0, 0)),        # text (resident over q)
            pl.BlockSpec((1, 1, MAX_TEXT_LEN), lambda b, q: (b, 0, 0)),        # bias+mask row
        ],
        out_specs=pl.BlockSpec((1, tq, MAX_TEXT_LEN), lambda b, q: (b, q, 0)),
    )

    cost = pl.CostEstimate(
        flops=2 * B * Qp * MAX_TEXT_LEN * D,
        transcendentals=0,
        bytes_accessed=(v_mm.size * 2 + t_mm.size * 2
                        + add_row.size * 4 + B * Qp * MAX_TEXT_LEN * 4),
    )

    out = pl.pallas_call(
        _contrastive_embed_kernel,
        out_shape=jax.ShapeDtypeStruct((B, Qp, MAX_TEXT_LEN), jnp.float32),
        grid_spec=grid_spec,
        compiler_params=pltpu.CompilerParams(
            dimension_semantics=("parallel", "parallel")),
        cost_estimate=cost,
    )(scale, v_mm, t_mm, add_row)

    if Qp != Q:
        out = out[:, :Q, :]
    return out


def contrastive_embed_ref(visual_feat, encoded_text, text_token_mask,
                          log_scale, bias, matmul_dtype=jnp.bfloat16):
    """Pure-JAX reference mirroring the PyTorch forward (same bf16 matmul contract)."""
    res = jnp.einsum("bqd,btd->bqt",
                     visual_feat.astype(matmul_dtype),
                     encoded_text.astype(matmul_dtype),
                     preferred_element_type=jnp.float32)
    D = visual_feat.shape[-1]
    if log_scale is None or (isinstance(log_scale, str) and log_scale == "none"):
        pass
    elif isinstance(log_scale, str) and log_scale == "auto":
        res = res / math.sqrt(D)
    else:
        res = res * jnp.exp(jnp.float32(log_scale))
    if bias is not None:
        res = res + jnp.float32(bias)
    res = jnp.where(text_token_mask[:, None, :], res, -jnp.inf)
    B, Q, T = res.shape
    out = jnp.full((B, Q, MAX_TEXT_LEN), -jnp.inf, jnp.float32)
    return out.at[..., :T].set(res)


def _check(out, ref):
    finite = jnp.isfinite(ref)
    assert bool(jnp.all(jnp.isfinite(out) == finite))
    assert bool(jnp.allclose(jnp.where(finite, out, 0.0),
                             jnp.where(finite, ref, 0.0),
                             atol=1e-3, rtol=1e-3))


if __name__ == "__main__":
    key = jax.random.PRNGKey(0)
    k1, k2 = jax.random.split(key)

    B, Q, D, T = 2, 16, 32, 8   # batch, num_queries, d_model, text tokens

    visual_feat = jax.random.normal(k1, (B, Q, D), dtype=jnp.float32)
    encoded_text = jax.random.normal(k2, (B, T, D), dtype=jnp.float32)
    # deterministic mask: last 2 tokens of batch 1 are padding
    text_token_mask = jnp.array(
        [[True] * T,
         [True] * (T - 2) + [False] * 2], dtype=bool)

    # deterministic "learnable" parameters (module __init__ semantics)
    log_scale = 0.0                                    # float log_scale param
    bias = -math.log((1 - 0.01) / 0.01)                # bias=True init (-4.595...)

    out = contrastive_embed(visual_feat, encoded_text, text_token_mask,
                            log_scale, bias)
    out = jax.block_until_ready(out)
    assert out.shape == (B, Q, MAX_TEXT_LEN)
    _check(out, contrastive_embed_ref(visual_feat, encoded_text,
                                      text_token_mask, log_scale, bias))

    # also exercise the 'auto' / no-bias configuration
    out2 = jax.block_until_ready(
        contrastive_embed(visual_feat, encoded_text, text_token_mask,
                          "auto", None))
    _check(out2, contrastive_embed_ref(visual_feat, encoded_text,
                                       text_token_mask, "auto", None))

    print("KERNEL_OK")
</pallas_src>

<mosaic_0001>
module attributes {stable_mosaic.version = 11 : i64} {
  func.func @_contrastive_embed_kernel(%arg0: i32, %arg1: i32, %arg2: memref<1x1xf32, #tpu.memory_space<smem>>, %arg3: memref<1x16x32xbf16, #tpu.memory_space<vmem>>, %arg4: memref<1x256x32xbf16, #tpu.memory_space<vmem>>, %arg5: memref<1x1x256xf32, #tpu.memory_space<vmem>>, %arg6: memref<1x16x256xf32, #tpu.memory_space<vmem>>) attributes {dimension_semantics = [#tpu.dimension_semantics<parallel>, #tpu.dimension_semantics<parallel>], iteration_bounds = array<i64: 2, 1>, scalar_prefetch = 0 : i64, scratch_operands = 0 : i64, tpu.core_type = #tpu.core_type<tc>, window_params = [{transform_indices = @transform_0, window_bounds = array<i64: 1, 1>}, {transform_indices = @transform_1, window_bounds = array<i64: 1, 16, 32>}, {transform_indices = @transform_2, window_bounds = array<i64: 1, 256, 32>}, {transform_indices = @transform_3, window_bounds = array<i64: 1, 1, 256>}, {transform_indices = @transform_4, window_bounds = array<i64: 1, 16, 256>}]} {
    %c0 = arith.constant 0 : index
    %c0_0 = arith.constant 0 : index
    %c0_1 = arith.constant 0 : index
    %0 = vector.load %arg3[%c0, %c0_0, %c0_1] : memref<1x16x32xbf16, #tpu.memory_space<vmem>>, vector<1x16x32xbf16>
    %1 = vector.shape_cast %0 : vector<1x16x32xbf16> to vector<16x32xbf16>
    %c0_2 = arith.constant 0 : index
    %c0_3 = arith.constant 0 : index
    %c0_4 = arith.constant 0 : index
    %2 = vector.load %arg4[%c0_2, %c0_3, %c0_4] : memref<1x256x32xbf16, #tpu.memory_space<vmem>>, vector<1x256x32xbf16>
    %3 = vector.shape_cast %2 : vector<1x256x32xbf16> to vector<256x32xbf16>
    %cst = arith.constant dense<0.000000e+00> : vector<16x256xf32>
    %4 = tpu.matmul %1, %3, %cst {dimension_numbers = #tpu.dot_dimension_numbers<[1], [1], [0], [0], [0, 0, 1, 0], [], []>} : vector<16x32xbf16>, vector<256x32xbf16>, vector<16x256xf32> -> vector<16x256xf32>
    %c0_5 = arith.constant 0 : index
    %c0_6 = arith.constant 0 : index
    %5 = memref.load %arg2[%c0_5, %c0_6] : memref<1x1xf32, #tpu.memory_space<smem>>
    %6 = vector.broadcast %5 : f32 to vector<16x256xf32>
    %7 = arith.mulf %4, %6 : vector<16x256xf32>
    %c0_7 = arith.constant 0 : index
    %c0_8 = arith.constant 0 : index
    %c0_9 = arith.constant 0 : index
    %8 = vector.load %arg5[%c0_7, %c0_8, %c0_9] : memref<1x1x256xf32, #tpu.memory_space<vmem>>, vector<1x1x256xf32>
    %9 = vector.shape_cast %8 : vector<1x1x256xf32> to vector<1x256xf32>
    %10 = vector.broadcast %9 : vector<1x256xf32> to vector<16x256xf32>
    %11 = arith.addf %7, %10 : vector<16x256xf32>
    %c0_10 = arith.constant 0 : index
    %c0_11 = arith.constant 0 : index
    %c0_12 = arith.constant 0 : index
    %12 = vector.load %arg6[%c0_10, %c0_11, %c0_12] : memref<1x16x256xf32, #tpu.memory_space<vmem>>, vector<1x16x256xf32>
    %13 = vector.shape_cast %12 : vector<1x16x256xf32> to vector<16x256xf32>
    %14 = vector.shape_cast %11 : vector<16x256xf32> to vector<1x16x256xf32>
    tpu.vector_store %arg6[%c0_10, %c0_11, %c0_12], %14 {strides = array<i32>} : memref<1x16x256xf32, #tpu.memory_space<vmem>>, vector<1x16x256xf32>,
    return
  }
  func.func @transform_0(%arg0: i32, %arg1: i32) -> (i32, i32) {
    %c0_i32 = arith.constant 0 : i32
    %c0_i32_0 = arith.constant 0 : i32
    %c0_i32_1 = arith.constant 0 : i32
    return %c0_i32, %c0_i32_0 : i32, i32
  }
  func.func @transform_1(%arg0: i32, %arg1: i32) -> (i32, i32, i32) {
    %c0_i32 = arith.constant 0 : i32
    %c0_i32_0 = arith.constant 0 : i32
    return %arg0, %arg1, %c0_i32 : i32, i32, i32
  }
  func.func @transform_2(%arg0: i32, %arg1: i32) -> (i32, i32, i32) {
    %c0_i32 = arith.constant 0 : i32
    %c0_i32_0 = arith.constant 0 : i32
    %c0_i32_1 = arith.constant 0 : i32
    return %arg0, %c0_i32, %c0_i32_0 : i32, i32, i32
  }
  func.func @transform_3(%arg0: i32, %arg1: i32) -> (i32, i32, i32) {
    %c0_i32 = arith.constant 0 : i32
    %c0_i32_0 = arith.constant 0 : i32
    %c0_i32_1 = arith.constant 0 : i32
    return %arg0, %c0_i32, %c0_i32_0 : i32, i32, i32
  }
  func.func @transform_4(%arg0: i32, %arg1: i32) -> (i32, i32, i32) {
    %c0_i32 = arith.constant 0 : i32
    %c0_i32_0 = arith.constant 0 : i32
    return %arg0, %arg1, %c0_i32 : i32, i32, i32
  }
}

</mosaic_0001>

<bundles_post_ra>
// kernel: tpu_custom_call.1
= control target key start
LH: loop header
LB: loop body
LE: loop exit
PB: predicated region body
PF: predicated region fallthrough
CT: control target
= control target key end

     0   :  { %s1036_s0 = inlined_call_operand.<no memory space> [shape: f32[1,1], index: 0, kind: input, shape index: {}]   ;;  %s1037_s1 = inlined_call_operand.vmem [shape: bf16[2,16,32], index: 1, kind: input, shape index: {}]   ;;  %s1038_s2 = inlined_call_operand.vmem [shape: bf16[2,256,32], index: 2, kind: input, shape index: {}]   ;;  %s1039_s3 = inlined_call_operand.vmem [shape: f32[2,1,256], index: 3, kind: input, shape index: {}]   ;;  %s1040_s4 = inlined_call_operand.hbm [shape: f32[2,16,256], index: 4, kind: output, shape index: {}]  }
   0x1   :  { %9 = sst [smem:[#allocation2]] %s1036_s0 }
   0x2   :  { %10 = vsyncpa [#allocation4], 0 }
   0x3   :  { %12 = vsyncpa [#allocation4 + $0x1], 0  ;;  %s874_s17 = smov 0   ;;  %s876_s18 = smov 0  }
   0x4   :  { %s878_s19 = smov 0   ;;  %s880_s20 = smov 0  }
   0x5   :  { %s882_s21 = smov 0   ;;  %s884_s22 = smov 0  }
   0x6 LB: > { %s626_s0 = sadd.s32 4294967295, %s841_s22   ;;  %s627_s23 = sadd.s32 4294967294, %s841_s22   ;;  %s841_s22 = sphi %s884_s22, %s18_s22   ;;  %s837_s21 = sphi %s882_s21, %s1047_s21   ;;  %s833_s20 = sphi %s880_s20, %s1046_s20   ;;  %s829_s19 = sphi %s878_s19, %s1045_s19   ;;  %s825_s18 = sphi %s876_s18, %s1044_s18   ;;  %s821_s17 = sphi %s874_s17, %s1043_s17  }
   0x7   : > { %s30_s24 = sadd.s32 1, %s837_s21  ;;  %s140_s25 = sadd.s32 1, %s829_s19 }
   0x8   : > { %p32_p0 = scmp.ge.s32.totalorder %s30_s24, 2  ;;  %p150_p1 = scmp.ne.s32.totalorder %s829_s19, %s825_s18 }
   0x9   : > { %p151_p2 = scmp.eq.s32.totalorder %s626_s0, 1  ;;  %p156_p3 = scmp.ne.s32.totalorder %s825_s18, %s821_s17 }
   0xa   : > { %s1049_s24 = smov (%p32_p0, %s30_s24), 0  ;;  %p157_p5 = scmp.eq.s32.totalorder %s627_s23, 1 }
   0xb   : > { %p914_p4 = por %p151_p2, %p150_p1  ;;  %s135_s27 = ssub.s32 %s837_s21, %s1049_s24 }
   0xc   : > { %p630_p6 = scmp.ge.s32.totalorder %s841_s22, 1  ;;  %p138_p7 = scmp.eq.s32.totalorder %s135_s27, 0 }
   0xd   : > { %p921_p8 = por %p157_p5, %p156_p3  ;;  %p206_p9 = scmp.lt.s32.totalorder %s841_s22, 3 }
   0xe   : > { %s927_s29 = scalar_select %p138_p7, %s829_s19, %s140_s25  }
   0xf   : > { %p207_p10 = pnand %p630_p6, %p206_p9 }
  0x10   : > { %p246_p11 = scmp.lt.s32.totalorder (!%p207_p10), %s833_s20, 1  ;;  %vm385_vm0 = vcmask (!%p207_p10), 261120   ;;  %v488_v25 = vlaneseq (!%p207_p10)  ;;  %s480_s14 = sld [smem:[#allocation2]] (!%p207_p10) }
  0x11   : > { %210 = sbr.rel (%p207_p10) target bundleno = 328 (0x148), region = 36  ;;  %s242_s23 = sand.u32 (!%p207_p10), 1, %s825_s18  }
  0x12   : > { %v489_v26 = vshrl.u32 (!%p207_p10), %v488_v25, 7  ;;  %s631_s25 = sshll.u32 (!%p207_p10), %s242_s23, 5  ;;  %s843_s10 = smov (!%p207_p10), [#allocation3]  }
  0x13   : > { %s244_s27 = scalar_lea.vmem (!%p207_p10), [#allocation3], %s631_s25  ;;  %s767_s11 = sshll.u32 (!%p207_p10), %s843_s10, 4  ;;  %s768_s11 = int_to_ptr.vmem [resolvable:$false] %s767_s11 }
  0x14   : > { %v490_v27 = vsub.s32 (!%p207_p10), 0, %v489_v26  ;;  %v494_v29 = vsub.s32 (!%p207_p10), 1, %v489_v26 }
  0x16   : > { %v481_v30 = vstv (!%p207_p10), %s480_s14 }
  0x18   : > { %s931_s30 = scalar_select %p246_p11, %s833_s20, 1 }
  0x1a   : > { %s661_s5 = sshll.u32 %s931_s30, 7  ;;  %s660_s9 = sshll.u32 %s931_s30, 3 }
  0x1b   : > { %s937_s8 = scalar_lea.vmem %s1038_s2, %s661_s5  ;;  %s253_s12 = scalar_lea.vmem %s1037_s1, %s660_s9 }
  0x1c   : > { %v746_v0 = vld [vmem:[%s937_s8 + $0x40] sm:$0xff]   ;;  %v748_v2 = vld [vmem:[%s937_s8 + $0x48] sm:$0xff]   ;;  %v750_v6 = vld [vmem:[%s937_s8 + $0x50] sm:$0xff]   ;;  %s636_s13 = sshll.u32 %s931_s30, 1  ;;  %s523_s30 = sshll.u32 %s244_s27, 4  ;;  %s983_s30 = int_to_ptr.vmem [resolvable:$true] %s523_s30 }
  0x1d   : > { %v747_v1 = vld [vmem:[%s937_s8] sm:$0xff]   ;;  %681 = vmatprep.subr.msk.bf16.mxu0 %vm385_vm0, %v746_v0  ;;  %v749_v4 = vld [vmem:[%s937_s8 + $0x8] sm:$0xff]   ;;  %v751_v7 = vld [vmem:[%s937_s8 + $0x10] sm:$0xff]   ;;  %s263_s0 = scalar_lea.vmem %s1039_s3, %s636_s13  ;;  %s662_s5 = sshll.u32 %s833_s20, 9 }
  0x1e   : > { %v390_v3 = vsel %vm385_vm0, %v747_v1, 0  ;;  %v393_v5 = vsel %vm385_vm0, %v749_v4, 0  ;;  %v762_v8 = vld [vmem:[%s253_s12] sm:$0xff]   ;;  %v396_v9 = vsel %vm385_vm0, %v751_v7, 0  ;;  %v752_v10 = vld [vmem:[%s937_s8 + $0x58] sm:$0xff]   ;;  %v756_v16 = vld [vmem:[%s937_s8 + $0x68] sm:$0xff]   ;;  %p770_p1 = scmp.lt.s32.totalorder %s983_s30, %s768_s11 }
  0x1f   : > { %664 = vmatpush3.bf16.xpose.msra.mxu0 %v390_v3  ;;  %679 = vmatprep.mubr.msk.bf16.mxu0 %vm385_vm0, %v762_v8  ;;  %v753_v11 = vld [vmem:[%s937_s8 + $0x18] sm:$0xff]   ;;  %v754_v13 = vld [vmem:[%s937_s8 + $0x60] sm:$0xff]   ;;  %v757_v17 = vld [vmem:[%s937_s8 + $0x28] sm:$0xff]   ;;  %s990_s20 = scalar_lea.sflag [#allocation4], %s242_s23  ;;  %s763_s9 = scalar_lea.vmem %s983_s30, 512 }
  0x20   : > { %682 = vmatprep.subr.msk.bf16.mxu0 %vm385_vm0, %v748_v2  ;;  %v399_v12 = vsel %vm385_vm0, %v753_v11, 0  ;;  %v755_v14 = vld [vmem:[%s937_s8 + $0x20] sm:$0xff]   ;;  %v405_v18 = vsel %vm385_vm0, %v757_v17, 0  ;;  %v758_v19 = vld [vmem:[%s937_s8 + $0x70] sm:$0xff]   ;;  %v760_v22 = vld [vmem:[%s937_s8 + $0x78] sm:$0xff]   ;;  %p764_p12 = scmp.ne.s32.totalorder %s983_s30, %s763_s9  ;;  %s769_s12 = scalar_lea.vmem %s768_s11, 1024 }
  0x21   : > { %v402_v15 = vsel %vm385_vm0, %v755_v14, 0  ;;  %v759_v20 = vld [vmem:[%s937_s8 + $0x30] sm:$0xff]   ;;  %v761_v23 = vld [vmem:[%s937_s8 + $0x38] sm:$0xff]   ;;  %v486_v28 = vld [vmem:[%s263_s0] sm:$0x3]  ;;  %s988_s8 = scalar_lea.hbm %s1040_s4, %s662_s5  ;;  %p771_p2 = scmp.lt.s32.totalorder %s769_s12, %s763_s9 }
  0x22   : > { %v408_v21 = vsel %vm385_vm0, %v759_v20, 0  ;;  %v411_v24 = vsel %vm385_vm0, %v761_v23, 0  ;;  %v491_v31 = vrot.slane %v486_v28, %v490_v27  ;;  %v495_v33 = vrot.slane %v486_v28, %v494_v29  ;;  %p765_p13 = pnand %p764_p12, %p914_p4 }
  0x23   : > { %p772_p3 = por %p771_p2, %p770_p1 }
  0x24   : > { %p766_p0 = pneg %p765_p13 }
  0x26   : > { %p773_p5 = pnand %p772_p3, %p766_p0 }
  0x27   : > { %666 = vmatpush3.bf16.xpose.msra.mxu0 %v393_v5 }
  0x28   : > { %683 = vmatprep.subr.msk.bf16.mxu0 %vm385_vm0, %v750_v6 }
  0x2f   : > { %668 = vmatpush3.bf16.xpose.msra.mxu0 %v396_v9 }
  0x30   : > { %684 = vmatprep.subr.msk.bf16.mxu0 %vm385_vm0, %v752_v10 }
  0x37   : > { %670 = vmatpush3.bf16.xpose.msra.mxu0 %v399_v12 }
  0x38   : > { %685 = vmatprep.subr.msk.bf16.mxu0 %vm385_vm0, %v754_v13 }
  0x3f   : > { %672 = vmatpush3.bf16.xpose.msra.mxu0 %v402_v15 }
  0x40   : > { %686 = vmatprep.subr.msk.bf16.mxu0 %vm385_vm0, %v756_v16 }
  0x47   : > { %674 = vmatpush3.bf16.xpose.msra.mxu0 %v405_v18 }
  0x48   : > { %687 = vmatprep.subr.msk.bf16.mxu0 %vm385_vm0, %v758_v19 }
  0x4f   : > { %676 = vmatpush3.bf16.xpose.msra.mxu0 %v408_v21 }
  0x50   : > { %688 = vmatprep.subr.msk.bf16.mxu0 %vm385_vm0, %v760_v22 }
  0x57   : > { %678 = vmatpush3.bf16.xpose.msra.mxu0 %v411_v24 }
  0x5e   : > { %680 = vmatmul.mubr.msk.bf16.vlgmr.msra.gmra.mrb[0].mxu0 %vm385_vm0, %v762_v8 }
 0x131   : > { %v471_v32 = vpop.f32.mrb[0].mxu0 }
 0x132   : > { %v482_v34 = vmul.f32 %v481_v30, %v471_v32  ;;  %v473_v35 = vpop.f32.mrb[1].mxu0 }
 0x133   : > { %v483_v36 = vmul.f32 %v481_v30, %v473_v35  ;;  %v475_v37 = vpop.f32.mrb[2].mxu0 }
 0x134   : > { %v498_v38 = vadd.f32 %v491_v31, %v482_v34  ;;  %v484_v39 = vmul.f32 %v481_v30, %v475_v37  ;;  %v477_v40 = vpop.f32.mrb[3].mxu0 }
 0x135   : > { %v499_v41 = vadd.f32 %v495_v33, %v483_v36  ;;  %v485_v42 = vmul.f32 %v481_v30, %v477_v40 }
 0x136   : > { %502 = vst [vmem:[%s244_s27] sm:$0xff] %v498_v38  ;;  %v500_v43 = vadd.f32 %v491_v31, %v484_v39 }
 0x137   : > { %503 = vst [vmem:[%s244_s27 + $0x8] sm:$0xff] %v499_v41  ;;  %v501_v44 = vadd.f32 %v495_v33, %v485_v42 }
 0x138   : > { %504 = vst [vmem:[%s244_s27 + $0x10] sm:$0xff] %v500_v43 }
 0x139   : > { %505 = vst [vmem:[%s244_s27 + $0x18] sm:$0xff] %v501_v44 }
 0x13a   : > { %776 = shalt.err (!%p773_p5)
}
 0x13b   : > { %s777_s13 = scalar_lea.hbm %s988_s8, 512  ;;  %s781_s16 = scalar_lea.hbm %s1040_s4, 1024 }
 0x13c   : > { %p778_p6 = scmp.ne.s32.totalorder %s988_s8, %s777_s13  ;;  %p782_p10 = scmp.lt.u32.totalorder %s988_s8, %s1040_s4 }
 0x13d   : > { %p783_p11 = scmp.lt.u32.totalorder %s781_s16, %s777_s13  ;;  %p785_p13 = scmp.lt.u32.totalorder %s777_s13, %s988_s8 }
 0x13e   : > { %p779_p7 = pnand %p778_p6, %p914_p4 }
 0x13f   : > { %p784_p12 = por %p783_p11, %p782_p10 }
 0x140   : > { %p780_p9 = pneg %p779_p7 }
 0x141   : > { %p786_p0 = por %p785_p13, %p784_p12 }
 0x143   : > { %p787_p1 = pnand %p786_p0, %p780_p9 }
 0x145   : > { %790 = shalt.err (!%p787_p1)
}
 0x146   : > { %s844_s25 = smov 256   ;;  %s845_s27 = smov 16  }
 0x147   : > { %689 = dma.vmem_to_hbm [thread:$0]  (%p914_p4), %s983_s30, 512, %s988_s8, %s990_s20, %s844_s25, %s844_s25, %s845_s27  }
 0x148 PF: > { %p695_p2 = scmp.ge.s32.totalorder %s841_s22, 2  ;;  %s538_s5 = sand.u32 1, %s821_s17  }
 0x149   : > { %s539_s6 = scalar_lea.sflag [#allocation4], %s538_s5 }
 0x14a   : > { %p692_p3 = pnand %p695_p2, %p921_p8 }
 0x14c   : > { %816 = dma.done.wait (!%p692_p3), %s539_s6, 512  }
 0x14d   : > { %818 = vsyncadd (!%p692_p3), %s539_s6, 4294966784  ;;  %s18_s22 = sadd.s32 1, %s841_s22   ;;  %s1043_s17 = smov %s825_s18 }
 0x14e   : > { %p15_p5 = scmp.ge.s32.totalorder %s18_s22, 4   ;;  %s1044_s18 = smov %s829_s19 }
 0x14f   : > { %s1045_s19 = smov %s927_s29  ;;  %s1046_s20 = smov %s837_s21 }
 0x150   : > { %s1047_s21 = smov %s1049_s24  ;;  %17 = sbr.rel (!%p15_p5) target bundleno = 6 (0x6), region = 77 }
 0x157   :  { %544 = vsyncpa [#allocation4], 1 }
 0x158   :  { %546 = vsyncpa [#allocation4 + $0x1], 1 }

</bundles_post_ra>
